<compile_context>
chip_gen: v6e
topology: v6e:2x2x1
jax: 0.10.0
libtpu: 0.0.40
codegen_flags: <defaults>
</compile_context>

<pallas_src>
import functools

import jax
import jax.numpy as jnp
from jax.experimental import pallas as pl
from jax.experimental.pallas import tpu as pltpu


def _round_up(x, m):
    return (x + m - 1) // m * m


def _slab_layout(n_classes, n_domains, n_experts):
    """Lane offsets inside the packed 128-lane output slab / head column."""
    causal_off = _round_up(n_classes, 8)
    style_off = causal_off + _round_up(n_classes, 8)
    gate_off = style_off + _round_up(n_domains, 8)
    slab_width = _round_up(gate_off + n_experts, 128)
    return causal_off, style_off, gate_off, slab_width


def _cadrup_head_kernel(feats_ref, wbig_ref, bbig_ref, w2_ref, b2_ref, out_ref, *,
                        n_classes, n_experts, slab_width, cls_pad, gate_off):
    f = feats_ref[...]                                                  # (TB, F), read once

    # One wide matmul: causal + style + gating logits and all expert fc1 hiddens.
    big = jnp.dot(f, wbig_ref[...], preferred_element_type=jnp.float32) + bbig_ref[...]
    head = big[:, :slab_width]           # causal @ [32,..), style @ [64,..), gates @ gate_off
    hidden = jnp.maximum(big[:, slab_width:], 0.0)                      # ReLU(fc1), (TB, E*128)
    # TODO(synk): Dropout is identity (eval mode); the mc_dropout=True branch (stochastic MC
    # passes + per-sample uncertainties) is not implemented in-kernel.

    # Block-diagonal fc2: all expert class logits from one matmul.
    logits2 = jnp.dot(hidden, w2_ref[...], preferred_element_type=jnp.float32) + b2_ref[...]

    # Gating softmax (non-MC path: uncertainties == 0 drop out of the logits).
    gl = head[:, gate_off:gate_off + n_experts]                         # (TB, E)
    ge = jnp.exp(gl - jnp.max(gl, axis=-1, keepdims=True))
    gates = ge * pl.reciprocal(jnp.sum(ge, axis=-1, keepdims=True), approx=False)

    # Per-expert masked softmax over its 128-lane column + gated mixture.
    tb = f.shape[0]
    lane = jax.lax.broadcasted_iota(jnp.int32, (tb, cls_pad), 1)
    cmask = lane < n_classes
    acc = jnp.zeros((tb, cls_pad), jnp.float32)
    for e in range(n_experts):                                          # E static -> unrolled
        le = logits2[:, e * cls_pad:(e + 1) * cls_pad]                  # aligned column slice
        le = jnp.where(cmask, le, -1e30)
        p = jnp.where(cmask, jnp.exp(le - jnp.max(le, axis=-1, keepdims=True)), 0.0)
        p = p * pl.reciprocal(jnp.sum(p, axis=-1, keepdims=True), approx=False)
        acc = acc + gates[:, e:e + 1] * p

    # acc: final probs in lanes [0,C), zeros elsewhere.  head: zeros in [0,32), causal/style
    # logits at their offsets.  Sum -> ONE lane-dense unmasked 128-lane store.
    out_ref[...] = (acc + head).astype(out_ref.dtype)


@functools.partial(jax.jit, static_argnames=("n_classes", "n_domains", "n_experts", "hidden"))
def cadrup_forward(feats, packed, *, n_classes, n_domains, n_experts, hidden):
    """Fused CADRUP head: returns (final_output, causal_logits, style_logits, uncertainties)."""
    B, feat_dim = feats.shape
    causal_off, style_off, gate_off, slab_width = _slab_layout(n_classes, n_domains, n_experts)
    hid_pad = _round_up(hidden, 128)
    cls_pad = _round_up(n_classes, 128)
    assert cls_pad == slab_width, "packed layout assumes heads and classes fit in 128 lanes"

    # Batch tiling: whole batch in one step when small; >= 2 "parallel" steps for larger B
    # (lets v7x's two TensorCores shard the grid).  Tile rows stay a multiple of 8 (sublanes).
    if B <= 128:
        tb = _round_up(B, 8)
    else:
        tb = min(512, _round_up(pl.cdiv(B, 2), 8))
    Bp = _round_up(B, tb)
    feats_p = feats if Bp == B else jnp.pad(feats, ((0, Bp - B), (0, 0)))
    grid = (Bp // tb,)

    P1 = slab_width + n_experts * hid_pad
    P2 = n_experts * cls_pad

    kernel = functools.partial(
        _cadrup_head_kernel, n_classes=n_classes, n_experts=n_experts,
        slab_width=slab_width, cls_pad=cls_pad, gate_off=gate_off)

    slab = pl.pallas_call(
        kernel,
        grid=grid,
        in_specs=[
            pl.BlockSpec((tb, feat_dim), lambda i: (i, 0)),
            # Constant index maps: packed weights/biases stay VMEM-resident across grid steps.
            pl.BlockSpec((feat_dim, P1), lambda i: (0, 0)),
            pl.BlockSpec((1, P1), lambda i: (0, 0)),
            pl.BlockSpec((n_experts * hid_pad, P2), lambda i: (0, 0)),
            pl.BlockSpec((1, P2), lambda i: (0, 0)),
        ],
        out_specs=pl.BlockSpec((tb, slab_width), lambda i: (i, 0)),
        out_shape=jax.ShapeDtypeStruct((Bp, slab_width), feats.dtype),
        compiler_params=pltpu.CompilerParams(dimension_semantics=("parallel",)),
    )(feats_p, packed["wbig"], packed["bbig"], packed["w2bd"], packed["b2bd"])

    final = slab[:B, :n_classes]
    causal = slab[:B, causal_off:causal_off + n_classes]
    style = slab[:B, style_off:style_off + n_domains]
    unc = jnp.zeros((B, n_experts), feats.dtype)   # non-MC path: constant zeros (wrapper-side)
    return final, causal, style, unc


# ---------------- init-time parameter construction (one-time layout prep) -------------

def _linear_init(key, out_dim, in_dim):
    kw, kb = jax.random.split(key)
    bound = 1.0 / jnp.sqrt(jnp.float32(in_dim))
    w = jax.random.uniform(kw, (out_dim, in_dim), jnp.float32, -bound, bound)
    b = jax.random.uniform(kb, (out_dim,), jnp.float32, -bound, bound)
    return w, b


def init_raw_params(key, feat_dim, n_classes, n_domains, n_experts, hidden=128):
    """Native PyTorch-layout (out_features, in_features) parameters."""
    keys = jax.random.split(key, 3 + 2 * n_experts)
    wc, bc = _linear_init(keys[0], n_classes, feat_dim)
    ws, bs = _linear_init(keys[1], n_domains, feat_dim)
    wg, bg = _linear_init(keys[2], n_experts, feat_dim)
    w1s, b1s, w2s, b2s = [], [], [], []
    for e in range(n_experts):
        w1, b1 = _linear_init(keys[3 + 2 * e], hidden, feat_dim)
        w2, b2 = _linear_init(keys[4 + 2 * e], n_classes, hidden)
        w1s.append(w1); b1s.append(b1); w2s.append(w2); b2s.append(b2)
    return {"wc": wc, "bc": bc, "ws": ws, "bs": bs, "wg": wg, "bg": bg,
            "w1": jnp.stack(w1s), "b1": jnp.stack(b1s),
            "w2": jnp.stack(w2s), "b2": jnp.stack(b2s)}


def pack_params(raw, *, n_classes, n_domains, n_experts, feat_dim, hidden):
    """One-time packing: (F, N)-layout concatenated fc1 matrix + block-diagonal fc2."""
    causal_off, style_off, gate_off, slab_width = _slab_layout(n_classes, n_domains, n_experts)
    hid_pad = _round_up(hidden, 128)
    cls_pad = _round_up(n_classes, 128)
    P1 = slab_width + n_experts * hid_pad
    P2 = n_experts * cls_pad

    wbig = jnp.zeros((feat_dim, P1), jnp.float32)
    bbig = jnp.zeros((1, P1), jnp.float32)
    wbig = wbig.at[:, causal_off:causal_off + n_classes].set(raw["wc"].T)
    bbig = bbig.at[0, causal_off:causal_off + n_classes].set(raw["bc"])
    wbig = wbig.at[:, style_off:style_off + n_domains].set(raw["ws"].T)
    bbig = bbig.at[0, style_off:style_off + n_domains].set(raw["bs"])
    wbig = wbig.at[:, gate_off:gate_off + n_experts].set(raw["wg"].T)
    bbig = bbig.at[0, gate_off:gate_off + n_experts].set(raw["bg"])

    w2bd = jnp.zeros((n_experts * hid_pad, P2), jnp.float32)
    b2bd = jnp.zeros((1, P2), jnp.float32)
    for e in range(n_experts):
        c1 = slab_width + e * hid_pad
        wbig = wbig.at[:, c1:c1 + hidden].set(raw["w1"][e].T)
        bbig = bbig.at[0, c1:c1 + hidden].set(raw["b1"][e])
        w2bd = w2bd.at[e * hid_pad:e * hid_pad + hidden,
                       e * cls_pad:e * cls_pad + n_classes].set(raw["w2"][e].T)
        b2bd = b2bd.at[0, e * cls_pad:e * cls_pad + n_classes].set(raw["b2"][e])

    return {"wbig": wbig, "bbig": bbig, "w2bd": w2bd, "b2bd": b2bd}


def ref_forward(feats, raw):
    causal = feats @ raw["wc"].T + raw["bc"]
    style = feats @ raw["ws"].T + raw["bs"]
    gates = jax.nn.softmax(feats @ raw["wg"].T + raw["bg"], axis=1)
    experts = []
    for e in range(raw["w1"].shape[0]):
        h = jax.nn.relu(feats @ raw["w1"][e].T + raw["b1"][e])
        experts.append(jax.nn.softmax(h @ raw["w2"][e].T + raw["b2"][e], axis=1))
    stack = jnp.stack(experts, axis=1)                                  # (B, E, C)
    final = jnp.sum(gates[:, :, None] * stack, axis=1)
    unc = jnp.zeros((feats.shape[0], raw["w1"].shape[0]), feats.dtype)
    return final, causal, style, unc


if __name__ == "__main__":
    n_classes = 31
    n_domains = 3      # ['amazon', 'dslr', 'webcam']
    n_experts = 3
    feat_dim = 256     # SharedBackbone out_dim default
    hidden = 128       # Expert hidden width
    batch = 8

    key = jax.random.PRNGKey(0)
    kp, kx = jax.random.split(key)
    raw = init_raw_params(kp, feat_dim, n_classes, n_domains, n_experts, hidden)
    packed = pack_params(raw, n_classes=n_classes, n_domains=n_domains,
                         n_experts=n_experts, feat_dim=feat_dim, hidden=hidden)

    # TODO(synk): SharedBackbone's pretrained ResNet-18 conv stack is not translated
    # (needs external torchvision weights); the kernel consumes its (B, feat_dim) output.
    feats = jax.random.normal(kx, (batch, feat_dim), jnp.float32)

    out = cadrup_forward(feats, packed, n_classes=n_classes, n_domains=n_domains,
                         n_experts=n_experts, hidden=hidden)
    jax.block_until_ready(out)

    final, causal, style, unc = out
    r_final, r_causal, r_style, r_unc = ref_forward(feats, raw)

    assert final.shape == (batch, n_classes)
    assert causal.shape == (batch, n_classes)
    assert style.shape == (batch, n_domains)
    assert unc.shape == (batch, n_experts)
    assert jnp.allclose(causal, r_causal, atol=1e-4, rtol=1e-4)
    assert jnp.allclose(style, r_style, atol=1e-4, rtol=1e-4)
    assert jnp.allclose(final, r_final, atol=1e-4, rtol=1e-4)
    assert jnp.allclose(unc, r_unc)

    # Tiled path: B=256 -> 2 parallel grid steps (exercises megacore sharding).
    feats_big = jax.random.normal(kx, (256, feat_dim), jnp.float32)
    out_big = cadrup_forward(feats_big, packed, n_classes=n_classes, n_domains=n_domains,
                             n_experts=n_experts, hidden=hidden)
    jax.block_until_ready(out_big)
    rb = ref_forward(feats_big, raw)
    assert jnp.allclose(out_big[0], rb[0], atol=1e-4, rtol=1e-4)
    assert jnp.allclose(out_big[1], rb[1], atol=1e-4, rtol=1e-4)
    assert jnp.allclose(out_big[2], rb[2], atol=1e-4, rtol=1e-4)

    # Non-multiple batch: exercises the zero-pad + slice-back path.
    feats_odd = jax.random.normal(kx, (200, feat_dim), jnp.float32)
    out_odd = cadrup_forward(feats_odd, packed, n_classes=n_classes, n_domains=n_domains,
                             n_experts=n_experts, hidden=hidden)
    jax.block_until_ready(out_odd)
    ro = ref_forward(feats_odd, raw)
    assert jnp.allclose(out_odd[0], ro[0], atol=1e-4, rtol=1e-4)
    assert jnp.allclose(out_odd[1], ro[1], atol=1e-4, rtol=1e-4)
    assert jnp.allclose(out_odd[2], ro[2], atol=1e-4, rtol=1e-4)

    print("KERNEL_OK")
</pallas_src>

<mosaic_0001>
module attributes {stable_mosaic.version = 11 : i64} {
  func.func @_cadrup_head_kernel(%arg0: i32, %arg1: memref<8x256xf32, #tpu.memory_space<vmem>>, %arg2: memref<256x512xf32, #tpu.memory_space<vmem>>, %arg3: memref<1x512xf32, #tpu.memory_space<vmem>>, %arg4: memref<384x384xf32, #tpu.memory_space<vmem>>, %arg5: memref<1x384xf32, #tpu.memory_space<vmem>>, %arg6: memref<8x128xf32, #tpu.memory_space<vmem>>) attributes {dimension_semantics = [#tpu.dimension_semantics<parallel>], iteration_bounds = array<i64: 1>, scalar_prefetch = 0 : i64, scratch_operands = 0 : i64, tpu.core_type = #tpu.core_type<tc>, window_params = [{transform_indices = @transform_0, window_bounds = array<i64: 8, 256>}, {pipeline_mode = #tpu.pipeline_mode<synchronous>, transform_indices = @transform_1, window_bounds = array<i64: 256, 512>}, {pipeline_mode = #tpu.pipeline_mode<synchronous>, transform_indices = @transform_2, window_bounds = array<i64: 1, 512>}, {pipeline_mode = #tpu.pipeline_mode<synchronous>, transform_indices = @transform_3, window_bounds = array<i64: 384, 384>}, {pipeline_mode = #tpu.pipeline_mode<synchronous>, transform_indices = @transform_4, window_bounds = array<i64: 1, 384>}, {transform_indices = @transform_5, window_bounds = array<i64: 8, 128>}]} {
    %c0 = arith.constant 0 : index
    %c0_0 = arith.constant 0 : index
    %0 = vector.load %arg1[%c0, %c0_0] : memref<8x256xf32, #tpu.memory_space<vmem>>, vector<8x256xf32>
    %c0_1 = arith.constant 0 : index
    %c0_2 = arith.constant 0 : index
    %1 = vector.load %arg2[%c0_1, %c0_2] : memref<256x512xf32, #tpu.memory_space<vmem>>, vector<256x512xf32>
    %cst = arith.constant dense<0.000000e+00> : vector<8x512xf32>
    %2 = tpu.matmul %0, %1, %cst {dimension_numbers = #tpu.dot_dimension_numbers<[1], [0], [0], [1], [0, 0, 1, 1], [], []>} : vector<8x256xf32>, vector<256x512xf32>, vector<8x512xf32> -> vector<8x512xf32>
    %c0_3 = arith.constant 0 : index
    %c0_4 = arith.constant 0 : index
    %3 = vector.load %arg3[%c0_3, %c0_4] : memref<1x512xf32, #tpu.memory_space<vmem>>, vector<1x512xf32>
    %4 = vector.broadcast %3 : vector<1x512xf32> to vector<8x512xf32>
    %5 = arith.addf %2, %4 : vector<8x512xf32>
    %6 = vector.extract_strided_slice %5 {offsets = [0, 0], sizes = [8, 128], strides = [1, 1]} : vector<8x512xf32> to vector<8x128xf32>
    %7 = vector.extract_strided_slice %5 {offsets = [0, 128], sizes = [8, 384], strides = [1, 1]} : vector<8x512xf32> to vector<8x384xf32>
    %cst_5 = arith.constant 0.000000e+00 : f32
    %8 = vector.broadcast %cst_5 : f32 to vector<8x384xf32>
    %9 = arith.maximumf %7, %8 : vector<8x384xf32>
    %c0_6 = arith.constant 0 : index
    %c0_7 = arith.constant 0 : index
    %10 = vector.load %arg4[%c0_6, %c0_7] : memref<384x384xf32, #tpu.memory_space<vmem>>, vector<384x384xf32>
    %cst_8 = arith.constant dense<0.000000e+00> : vector<8x384xf32>
    %11 = tpu.matmul %9, %10, %cst_8 {dimension_numbers = #tpu.dot_dimension_numbers<[1], [0], [0], [1], [0, 0, 1, 1], [], []>} : vector<8x384xf32>, vector<384x384xf32>, vector<8x384xf32> -> vector<8x384xf32>
    %c0_9 = arith.constant 0 : index
    %c0_10 = arith.constant 0 : index
    %12 = vector.load %arg5[%c0_9, %c0_10] : memref<1x384xf32, #tpu.memory_space<vmem>>, vector<1x384xf32>
    %13 = vector.broadcast %12 : vector<1x384xf32> to vector<8x384xf32>
    %14 = arith.addf %11, %13 : vector<8x384xf32>
    %15 = vector.extract_strided_slice %6 {offsets = [0, 72], sizes = [8, 3], strides = [1, 1]} : vector<8x128xf32> to vector<8x3xf32>
    %cst_11 = arith.constant dense<0xFF800000> : vector<8xf32>
    %16 = vector.multi_reduction <maximumf>, %15, %cst_11 [1] : vector<8x3xf32> to vector<8xf32>
    %17 = vector.shape_cast %16 : vector<8xf32> to vector<8x1xf32>
    %18 = vector.broadcast %17 : vector<8x1xf32> to vector<8x3xf32>
    %19 = arith.subf %15, %18 : vector<8x3xf32>
    %20 = math.exp %19 : vector<8x3xf32>
    %cst_12 = arith.constant dense<0.000000e+00> : vector<8xf32>
    %21 = vector.multi_reduction <add>, %20, %cst_12 [1] : vector<8x3xf32> to vector<8xf32>
    %22 = vector.shape_cast %21 : vector<8xf32> to vector<8x1xf32>
    %23 = tpu.reciprocal %22 : vector<8x1xf32> -> vector<8x1xf32>
    %24 = vector.broadcast %23 : vector<8x1xf32> to vector<8x3xf32>
    %25 = arith.mulf %20, %24 : vector<8x3xf32>
    %26 = tpu.iota {dimensions = array<i32: 1>} : vector<8x128xi32>
    %c31_i32 = arith.constant 31 : i32
    %27 = vector.broadcast %c31_i32 : i32 to vector<8x128xi32>
    %28 = arith.cmpi slt, %26, %27 : vector<8x128xi32>
    %cst_13 = arith.constant 0.000000e+00 : f32
    %29 = vector.broadcast %cst_13 : f32 to vector<8x128xf32>
    %30 = vector.extract_strided_slice %14 {offsets = [0, 0], sizes = [8, 128], strides = [1, 1]} : vector<8x384xf32> to vector<8x128xf32>
    %cst_14 = arith.constant -1.000000e+30 : f32
    %31 = vector.broadcast %cst_14 : f32 to vector<8x128xf32>
    %32 = arith.select %28, %30, %31 : vector<8x128xi1>, vector<8x128xf32>
    %cst_15 = arith.constant dense<0xFF800000> : vector<8xf32>
    %33 = vector.multi_reduction <maximumf>, %32, %cst_15 [1] : vector<8x128xf32> to vector<8xf32>
    %34 = vector.shape_cast %33 : vector<8xf32> to vector<8x1xf32>
    %35 = vector.broadcast %34 : vector<8x1xf32> to vector<8x128xf32>
    %36 = arith.subf %32, %35 : vector<8x128xf32>
    %37 = math.exp %36 : vector<8x128xf32>
    %cst_16 = arith.constant 0.000000e+00 : f32
    %38 = vector.broadcast %cst_16 : f32 to vector<8x128xf32>
    %39 = arith.select %28, %37, %38 : vector<8x128xi1>, vector<8x128xf32>
    %cst_17 = arith.constant dense<0.000000e+00> : vector<8xf32>
    %40 = vector.multi_reduction <add>, %39, %cst_17 [1] : vector<8x128xf32> to vector<8xf32>
    %41 = vector.shape_cast %40 : vector<8xf32> to vector<8x1xf32>
    %42 = tpu.reciprocal %41 : vector<8x1xf32> -> vector<8x1xf32>
    %43 = vector.broadcast %42 : vector<8x1xf32> to vector<8x128xf32>
    %44 = arith.mulf %39, %43 : vector<8x128xf32>
    %45 = vector.extract_strided_slice %25 {offsets = [0, 0], sizes = [8, 1], strides = [1, 1]} : vector<8x3xf32> to vector<8x1xf32>
    %46 = vector.broadcast %45 : vector<8x1xf32> to vector<8x128xf32>
    %47 = arith.mulf %46, %44 : vector<8x128xf32>
    %48 = arith.addf %29, %47 : vector<8x128xf32>
    %49 = vector.extract_strided_slice %14 {offsets = [0, 128], sizes = [8, 128], strides = [1, 1]} : vector<8x384xf32> to vector<8x128xf32>
    %cst_18 = arith.constant -1.000000e+30 : f32
    %50 = vector.broadcast %cst_18 : f32 to vector<8x128xf32>
    %51 = arith.select %28, %49, %50 : vector<8x128xi1>, vector<8x128xf32>
    %cst_19 = arith.constant dense<0xFF800000> : vector<8xf32>
    %52 = vector.multi_reduction <maximumf>, %51, %cst_19 [1] : vector<8x128xf32> to vector<8xf32>
    %53 = vector.shape_cast %52 : vector<8xf32> to vector<8x1xf32>
    %54 = vector.broadcast %53 : vector<8x1xf32> to vector<8x128xf32>
    %55 = arith.subf %51, %54 : vector<8x128xf32>
    %56 = math.exp %55 : vector<8x128xf32>
    %cst_20 = arith.constant 0.000000e+00 : f32
    %57 = vector.broadcast %cst_20 : f32 to vector<8x128xf32>
    %58 = arith.select %28, %56, %57 : vector<8x128xi1>, vector<8x128xf32>
    %cst_21 = arith.constant dense<0.000000e+00> : vector<8xf32>
    %59 = vector.multi_reduction <add>, %58, %cst_21 [1] : vector<8x128xf32> to vector<8xf32>
    %60 = vector.shape_cast %59 : vector<8xf32> to vector<8x1xf32>
    %61 = tpu.reciprocal %60 : vector<8x1xf32> -> vector<8x1xf32>
    %62 = vector.broadcast %61 : vector<8x1xf32> to vector<8x128xf32>
    %63 = arith.mulf %58, %62 : vector<8x128xf32>
    %64 = vector.extract_strided_slice %25 {offsets = [0, 1], sizes = [8, 1], strides = [1, 1]} : vector<8x3xf32> to vector<8x1xf32>
    %65 = vector.broadcast %64 : vector<8x1xf32> to vector<8x128xf32>
    %66 = arith.mulf %65, %63 : vector<8x128xf32>
    %67 = arith.addf %48, %66 : vector<8x128xf32>
    %68 = vector.extract_strided_slice %14 {offsets = [0, 256], sizes = [8, 128], strides = [1, 1]} : vector<8x384xf32> to vector<8x128xf32>
    %cst_22 = arith.constant -1.000000e+30 : f32
    %69 = vector.broadcast %cst_22 : f32 to vector<8x128xf32>
    %70 = arith.select %28, %68, %69 : vector<8x128xi1>, vector<8x128xf32>
    %cst_23 = arith.constant dense<0xFF800000> : vector<8xf32>
    %71 = vector.multi_reduction <maximumf>, %70, %cst_23 [1] : vector<8x128xf32> to vector<8xf32>
    %72 = vector.shape_cast %71 : vector<8xf32> to vector<8x1xf32>
    %73 = vector.broadcast %72 : vector<8x1xf32> to vector<8x128xf32>
    %74 = arith.subf %70, %73 : vector<8x128xf32>
    %75 = math.exp %74 : vector<8x128xf32>
    %cst_24 = arith.constant 0.000000e+00 : f32
    %76 = vector.broadcast %cst_24 : f32 to vector<8x128xf32>
    %77 = arith.select %28, %75, %76 : vector<8x128xi1>, vector<8x128xf32>
    %cst_25 = arith.constant dense<0.000000e+00> : vector<8xf32>
    %78 = vector.multi_reduction <add>, %77, %cst_25 [1] : vector<8x128xf32> to vector<8xf32>
    %79 = vector.shape_cast %78 : vector<8xf32> to vector<8x1xf32>
    %80 = tpu.reciprocal %79 : vector<8x1xf32> -> vector<8x1xf32>
    %81 = vector.broadcast %80 : vector<8x1xf32> to vector<8x128xf32>
    %82 = arith.mulf %77, %81 : vector<8x128xf32>
    %83 = vector.extract_strided_slice %25 {offsets = [0, 2], sizes = [8, 1], strides = [1, 1]} : vector<8x3xf32> to vector<8x1xf32>
    %84 = vector.broadcast %83 : vector<8x1xf32> to vector<8x128xf32>
    %85 = arith.mulf %84, %82 : vector<8x128xf32>
    %86 = arith.addf %67, %85 : vector<8x128xf32>
    %87 = arith.addf %86, %6 : vector<8x128xf32>
    %c0_26 = arith.constant 0 : index
    %c0_27 = arith.constant 0 : index
    %88 = vector.load %arg6[%c0_26, %c0_27] : memref<8x128xf32, #tpu.memory_space<vmem>>, vector<8x128xf32>
    tpu.vector_store %arg6[%c0_26, %c0_27], %87 {strides = array<i32>} : memref<8x128xf32, #tpu.memory_space<vmem>>, vector<8x128xf32>,
    return
  }
  func.func @transform_0(%arg0: i32) -> (i32, i32) {
    %c0_i32 = arith.constant 0 : i32
    %c0_i32_0 = arith.constant 0 : i32
    return %arg0, %c0_i32 : i32, i32
  }
  func.func @transform_1(%arg0: i32) -> (i32, i32) {
    %c0_i32 = arith.constant 0 : i32
    %c0_i32_0 = arith.constant 0 : i32
    %c0_i32_1 = arith.constant 0 : i32
    return %c0_i32, %c0_i32_0 : i32, i32
  }
  func.func @transform_2(%arg0: i32) -> (i32, i32) {
    %c0_i32 = arith.constant 0 : i32
    %c0_i32_0 = arith.constant 0 : i32
    %c0_i32_1 = arith.constant 0 : i32
    return %c0_i32, %c0_i32_0 : i32, i32
  }
  func.func @transform_3(%arg0: i32) -> (i32, i32) {
    %c0_i32 = arith.constant 0 : i32
    %c0_i32_0 = arith.constant 0 : i32
    %c0_i32_1 = arith.constant 0 : i32
    return %c0_i32, %c0_i32_0 : i32, i32
  }
  func.func @transform_4(%arg0: i32) -> (i32, i32) {
    %c0_i32 = arith.constant 0 : i32
    %c0_i32_0 = arith.constant 0 : i32
    %c0_i32_1 = arith.constant 0 : i32
    return %c0_i32, %c0_i32_0 : i32, i32
  }
  func.func @transform_5(%arg0: i32) -> (i32, i32) {
    %c0_i32 = arith.constant 0 : i32
    %c0_i32_0 = arith.constant 0 : i32
    return %arg0, %c0_i32 : i32, i32
  }
}

</mosaic_0001>

<bundles_post_ra>
// kernel: cadrup_forward.1
= control target key start
LH: loop header
LB: loop body
LE: loop exit
PB: predicated region body
PF: predicated region fallthrough
CT: control target
= control target key end

     0   :  { %10 = vsyncpa [#allocation3], 0  ;;  %s1224_s0 = inlined_call_operand.hbm [shape: f32[8,256], index: 0, kind: input, shape index: {}]   ;;  %s1225_s1 = inlined_call_operand.hbm [shape: f32[256,512], index: 1, kind: input, shape index: {}]   ;;  %s1226_s2 = inlined_call_operand.hbm [shape: f32[1,512], index: 2, kind: input, shape index: {}]   ;;  %s1227_s3 = inlined_call_operand.hbm [shape: f32[384,384], index: 3, kind: input, shape index: {}]   ;;  %s1228_s4 = inlined_call_operand.vmem [shape: f32[1,384], index: 4, kind: input, shape index: {}]   ;;  %s1229_s5 = inlined_call_operand.vmem [shape: f32[8,128], index: 5, kind: output, shape index: {}]  }
   0x1   :  { %11 = vsyncpa [#allocation5], 0 }
   0x2   :  { %12 = vsyncpa [#allocation8], 0  ;;  %s1099_s18 = smov [#allocation4]  }
   0x3   :  { %s28_s19 = sshll.u32 %s1099_s18, 4  ;;  %s29_s19 = int_to_ptr.vmem [resolvable:$true] %s28_s19 }
   0x4   :  { %s1021_s20 = scalar_lea.vmem %s29_s19, 16384  ;;  %p1026_p1 = scmp.lt.s32.totalorder %s29_s19, %s29_s19 }
   0x5   :  { %p1022_p0 = scmp.ne.s32.totalorder %s29_s19, %s1021_s20  ;;  %p1027_p2 = scmp.lt.s32.totalorder %s1021_s20, %s1021_s20 }
   0x7   :  { %p1028_p3 = por %p1027_p2, %p1026_p1 }
   0x9   :  { %p1029_p4 = pnand %p1028_p3, %p1022_p0 }
   0xb   :  { %1032 = shalt.err (!%p1029_p4)
}
   0xc   :  { %s1100_s21 = smov 512   ;;  %s1101_s22 = smov 32  }
   0xd   :  { %34 = dma.hbm_to_vmem [thread:$0]  %s1225_s1, 16384, %s29_s19, [#allocation5], %s1100_s21, %s1100_s21, %s1101_s22  }
   0xe   :  { %s1102_s25 = smov [#allocation2]   ;;  %s1103_s27 = smov [#allocation6]  }
   0xf   :  { %s19_s26 = sshll.u32 %s1102_s25, 4  ;;  %s41_s28 = sshll.u32 %s1103_s27, 4  ;;  %s20_s26 = int_to_ptr.vmem [resolvable:$true] %s19_s26  ;;  %s42_s28 = int_to_ptr.vmem [resolvable:$true] %s41_s28 }
  0x10   :  { %s1041_s29 = scalar_lea.vmem %s20_s26, 256  ;;  %p1046_p6 = scmp.lt.s32.totalorder %s20_s26, %s20_s26 }
  0x11   :  { %p1042_p5 = scmp.ne.s32.totalorder %s20_s26, %s1041_s29  ;;  %p1047_p7 = scmp.lt.s32.totalorder %s1041_s29, %s1041_s29 }
  0x13   :  { %p1048_p8 = por %p1047_p7, %p1046_p6 }
  0x15   :  { %p1049_p9 = pnand %p1048_p8, %p1042_p5 }
  0x17   :  { %1052 = shalt.err (!%p1049_p9)
}
  0x18   :  { %22 = dma.hbm_to_vmem [thread:$0]  %s1224_s0, 256, %s20_s26, [#allocation3]  }
  0x19   :  { %s1061_s7 = scalar_lea.vmem %s42_s28, 64  ;;  %p1066_p11 = scmp.lt.s32.totalorder %s42_s28, %s42_s28 }
  0x1a   :  { %p1062_p10 = scmp.ne.s32.totalorder %s42_s28, %s1061_s7  ;;  %p1067_p12 = scmp.lt.s32.totalorder %s1061_s7, %s1061_s7 }
  0x1c   :  { %p1068_p13 = por %p1067_p12, %p1066_p11 }
  0x1e   :  { %p1069_p0 = pnand %p1068_p13, %p1062_p10 }
  0x20   :  { %1072 = shalt.err (!%p1069_p0)
}
  0x21   :  { %44 = dma.hbm_to_vmem [thread:$0]  %s1226_s2, 64, %s42_s28, [#allocation5]  }
  0x22   :  { %s1104_s9 = smov [#allocation7]  }
  0x23   :  { %s50_s10 = sshll.u32 %s1104_s9, 4  ;;  %s51_s10 = int_to_ptr.vmem [resolvable:$true] %s50_s10 }
  0x24   :  { %s1081_s11 = scalar_lea.vmem %s51_s10, 18432  ;;  %p1086_p2 = scmp.lt.s32.totalorder %s51_s10, %s51_s10 }
  0x25   :  { %p1082_p1 = scmp.ne.s32.totalorder %s51_s10, %s1081_s11  ;;  %p1087_p3 = scmp.lt.s32.totalorder %s1081_s11, %s1081_s11 }
  0x27   :  { %p1088_p4 = por %p1087_p3, %p1086_p2 }
  0x29   :  { %p1089_p5 = pnand %p1088_p4, %p1082_p1 }
  0x2b   :  { %1092 = shalt.err (!%p1089_p5)
}
  0x2c   :  { %s1105_s0 = smov 384   ;;  %s1106_s12 = smov 24  }
  0x2d   :  { %56 = dma.hbm_to_vmem [thread:$0]  %s1227_s3, 18432, %s51_s10, [#allocation8], %s1105_s0, %s1105_s0, %s1106_s12  }
  0x2e   :  { %1093 = dma.done.wait [#allocation3], 256  }
  0x2f   :  { %1094 = vsyncadd [#allocation3], 4294967040 }
  0x30   :  { %1095 = dma.done.wait [#allocation5], 16448  }
  0x31   :  { %1096 = vsyncadd [#allocation5], 4294950848 }
  0x32   :  { %1097 = dma.done.wait [#allocation8], 18432  }
  0x33   :  { %1098 = vsyncadd [#allocation8], 4294948864  ;;  %v134_v0 = vld [vmem:[#allocation4 + $0x1e8] sm:$0xff]  ;;  %v136_v1 = vld [vmem:[#allocation4 + $0x1f8] sm:$0xff]  ;;  %vm811_vm0 = vcmask 613952   ;;  %vm1108_vm1 = vmmov 0  }
  0x34   :  { %v133_v2 = vld [vmem:[#allocation4 + $0x1e0] sm:$0xff]  ;;  %223 = vmatprep.subr.mxu0 %v134_v0  ;;  %294 = vmatprep.subr.mxu1 %v136_v1  ;;  %v135_v3 = vld [vmem:[#allocation4 + $0x1f0] sm:$0xff]  ;;  %v130_v4 = vld [vmem:[#allocation4 + $0x1c8] sm:$0xff]  ;;  %s1109_s2 = smov 56   ;;  %vm822_vm3 = vcmask 23552  }
  0x35   :  { %v132_v5 = vld [vmem:[#allocation4 + $0x1d8] sm:$0xff]  ;;  %224 = vmatpush1.msra.mxu0 %v133_v2  ;;  %295 = vmatpush1.msra.mxu1 %v135_v3  ;;  %v129_v6 = vld [vmem:[#allocation4 + $0x1c0] sm:$0xff]  ;;  %v131_v7 = vld [vmem:[#allocation4 + $0x1d0] sm:$0xff] }
  0x36   :  { %v126_v8 = vld [vmem:[#allocation4 + $0x1a8] sm:$0xff]  ;;  %225 = vmatprep.subr.mxu0 %v130_v4  ;;  %296 = vmatprep.subr.mxu1 %v132_v5  ;;  %v128_v9 = vld [vmem:[#allocation4 + $0x1b8] sm:$0xff]  ;;  %v125_v10 = vld [vmem:[#allocation4 + $0x1a0] sm:$0xff] }
  0x37   :  { %v127_v11 = vld [vmem:[#allocation4 + $0x1b0] sm:$0xff]  ;;  %226 = vmatpush1.msra.mxu0 %v129_v6  ;;  %297 = vmatpush1.msra.mxu1 %v131_v7  ;;  %v122_v12 = vld [vmem:[#allocation4 + $0x188] sm:$0xff]  ;;  %v124_v13 = vld [vmem:[#allocation4 + $0x198] sm:$0xff] }
  0x38   :  { %227 = vmatprep.subr.mxu0 %v126_v8  ;;  %298 = vmatprep.subr.mxu1 %v128_v9  ;;  %v121_v14 = vld [vmem:[#allocation4 + $0x180] sm:$0xff]  ;;  %v123_v15 = vld [vmem:[#allocation4 + $0x190] sm:$0xff]  ;;  %v118_v16 = vld [vmem:[#allocation4 + $0x168] sm:$0xff] }
  0x39   :  { %228 = vmatpush1.msra.mxu0 %v125_v10  ;;  %299 = vmatpush1.msra.mxu1 %v127_v11  ;;  %v120_v17 = vld [vmem:[#allocation4 + $0x178] sm:$0xff]  ;;  %v117_v18 = vld [vmem:[#allocation4 + $0x160] sm:$0xff]  ;;  %v119_v19 = vld [vmem:[#allocation4 + $0x170] sm:$0xff] }
  0x3a   :  { %229 = vmatprep.subr.mxu0 %v122_v12  ;;  %300 = vmatprep.subr.mxu1 %v124_v13  ;;  %v114_v20 = vld [vmem:[#allocation4 + $0x148] sm:$0xff]  ;;  %v116_v21 = vld [vmem:[#allocation4 + $0x158] sm:$0xff]  ;;  %v113_v22 = vld [vmem:[#allocation4 + $0x140] sm:$0xff] }
  0x3b   :  { %230 = vmatpush1.msra.mxu0 %v121_v14  ;;  %301 = vmatpush1.msra.mxu1 %v123_v15  ;;  %v115_v23 = vld [vmem:[#allocation4 + $0x150] sm:$0xff]  ;;  %v110_v24 = vld [vmem:[#allocation4 + $0x128] sm:$0xff]  ;;  %v112_v25 = vld [vmem:[#allocation4 + $0x138] sm:$0xff] }
  0x3c   :  { %231 = vmatprep.subr.mxu0 %v118_v16  ;;  %302 = vmatprep.subr.mxu1 %v120_v17  ;;  %v109_v26 = vld [vmem:[#allocation4 + $0x120] sm:$0xff]  ;;  %v111_v27 = vld [vmem:[#allocation4 + $0x130] sm:$0xff]  ;;  %v106_v28 = vld [vmem:[#allocation4 + $0x108] sm:$0xff] }
  0x3d   :  { %232 = vmatpush1.msra.mxu0 %v117_v18  ;;  %303 = vmatpush1.msra.mxu1 %v119_v19  ;;  %v108_v29 = vld [vmem:[#allocation4 + $0x118] sm:$0xff]  ;;  %v105_v30 = vld [vmem:[#allocation4 + $0x100] sm:$0xff]  ;;  %v107_v31 = vld [vmem:[#allocation4 + $0x110] sm:$0xff] }
  0x3e   :  { %233 = vmatprep.subr.mxu0 %v114_v20  ;;  %304 = vmatprep.subr.mxu1 %v116_v21  ;;  %v102_v32 = vld [vmem:[#allocation4 + $0xe8] sm:$0xff]  ;;  %v104_v33 = vld [vmem:[#allocation4 + $0xf8] sm:$0xff]  ;;  %v101_v34 = vld [vmem:[#allocation4 + $0xe0] sm:$0xff] }
  0x3f   :  { %234 = vmatpush1.msra.mxu0 %v113_v22  ;;  %305 = vmatpush1.msra.mxu1 %v115_v23  ;;  %v103_v35 = vld [vmem:[#allocation4 + $0xf0] sm:$0xff]  ;;  %v98_v36 = vld [vmem:[#allocation4 + $0xc8] sm:$0xff]  ;;  %v100_v37 = vld [vmem:[#allocation4 + $0xd8] sm:$0xff] }
  0x40   :  { %235 = vmatprep.subr.mxu0 %v110_v24  ;;  %306 = vmatprep.subr.mxu1 %v112_v25  ;;  %v97_v38 = vld [vmem:[#allocation4 + $0xc0] sm:$0xff]  ;;  %v99_v39 = vld [vmem:[#allocation4 + $0xd0] sm:$0xff]  ;;  %v94_v40 = vld [vmem:[#allocation4 + $0xa8] sm:$0xff] }
  0x41   :  { %236 = vmatpush1.msra.mxu0 %v109_v26  ;;  %307 = vmatpush1.msra.mxu1 %v111_v27  ;;  %v96_v41 = vld [vmem:[#allocation4 + $0xb8] sm:$0xff]  ;;  %v93_v42 = vld [vmem:[#allocation4 + $0xa0] sm:$0xff]  ;;  %v95_v43 = vld [vmem:[#allocation4 + $0xb0] sm:$0xff] }
  0x42   :  { %237 = vmatprep.subr.mxu0 %v106_v28  ;;  %308 = vmatprep.subr.mxu1 %v108_v29  ;;  %v90_v44 = vld [vmem:[#allocation4 + $0x88] sm:$0xff]  ;;  %v92_v45 = vld [vmem:[#allocation4 + $0x98] sm:$0xff]  ;;  %v89_v46 = vld [vmem:[#allocation4 + $0x80] sm:$0xff] }
  0x43   :  { %238 = vmatpush1.msra.mxu0 %v105_v30  ;;  %309 = vmatpush1.msra.mxu1 %v107_v31  ;;  %v91_v47 = vld [vmem:[#allocation4 + $0x90] sm:$0xff]  ;;  %v86_v48 = vld [vmem:[#allocation4 + $0x68] sm:$0xff]  ;;  %v88_v49 = vld [vmem:[#allocation4 + $0x78] sm:$0xff] }
  0x44   :  { %239 = vmatprep.subr.mxu0 %v102_v32  ;;  %310 = vmatprep.subr.mxu1 %v104_v33  ;;  %v85_v50 = vld [vmem:[#allocation4 + $0x60] sm:$0xff]  ;;  %v87_v51 = vld [vmem:[#allocation4 + $0x70] sm:$0xff]  ;;  %v82_v52 = vld [vmem:[#allocation4 + $0x48] sm:$0xff] }
  0x45   :  { %240 = vmatpush1.msra.mxu0 %v101_v34  ;;  %311 = vmatpush1.msra.mxu1 %v103_v35  ;;  %v84_v53 = vld [vmem:[#allocation4 + $0x58] sm:$0xff]  ;;  %v81_v54 = vld [vmem:[#allocation4 + $0x40] sm:$0xff]  ;;  %v83_v55 = vld [vmem:[#allocation4 + $0x50] sm:$0xff] }
  0x46   :  { %241 = vmatprep.subr.mxu0 %v98_v36  ;;  %312 = vmatprep.subr.mxu1 %v100_v37  ;;  %v78_v56 = vld [vmem:[#allocation4 + $0x28] sm:$0xff]  ;;  %v80_v57 = vld [vmem:[#allocation4 + $0x38] sm:$0xff]  ;;  %v77_v58 = vld [vmem:[#allocation4 + $0x20] sm:$0xff] }
  0x47   :  { %242 = vmatpush1.msra.mxu0 %v97_v38  ;;  %313 = vmatpush1.msra.mxu1 %v99_v39  ;;  %v79_v59 = vld [vmem:[#allocation4 + $0x30] sm:$0xff]  ;;  %v74_v60 = vld [vmem:[#allocation4 + $0x8] sm:$0xff]  ;;  %v76_v61 = vld [vmem:[#allocation4 + $0x18] sm:$0xff] }
  0x48   :  { %243 = vmatprep.subr.mxu0 %v94_v40  ;;  %314 = vmatprep.subr.mxu1 %v96_v41  ;;  %v73_v62 = vld [vmem:[#allocation4] sm:$0xff]  ;;  %v75_v63 = vld [vmem:[#allocation4 + $0x10] sm:$0xff]  ;;  %v198_v0 = vld [vmem:[#allocation4 + $0x3e8] sm:$0xff] }
  0x49   :  { %244 = vmatpush1.msra.mxu0 %v93_v42  ;;  %315 = vmatpush1.msra.mxu1 %v95_v43  ;;  %v200_v1 = vld [vmem:[#allocation4 + $0x3f8] sm:$0xff]  ;;  %v197_v2 = vld [vmem:[#allocation4 + $0x3e0] sm:$0xff]  ;;  %v199_v3 = vld [vmem:[#allocation4 + $0x3f0] sm:$0xff] }
  0x4a   :  { %245 = vmatprep.subr.mxu0 %v90_v44  ;;  %316 = vmatprep.subr.mxu1 %v92_v45  ;;  %v194_v4 = vld [vmem:[#allocation4 + $0x3c8] sm:$0xff]  ;;  %v196_v5 = vld [vmem:[#allocation4 + $0x3d8] sm:$0xff]  ;;  %v193_v6 = vld [vmem:[#allocation4 + $0x3c0] sm:$0xff] }
  0x4b   :  { %246 = vmatpush1.msra.mxu0 %v89_v46  ;;  %317 = vmatpush1.msra.mxu1 %v91_v47  ;;  %v195_v7 = vld [vmem:[#allocation4 + $0x3d0] sm:$0xff]  ;;  %v190_v8 = vld [vmem:[#allocation4 + $0x3a8] sm:$0xff]  ;;  %v192_v9 = vld [vmem:[#allocation4 + $0x3b8] sm:$0xff] }
  0x4c   :  { %247 = vmatprep.subr.mxu0 %v86_v48  ;;  %318 = vmatprep.subr.mxu1 %v88_v49  ;;  %v189_v10 = vld [vmem:[#allocation4 + $0x3a0] sm:$0xff]  ;;  %v191_v11 = vld [vmem:[#allocation4 + $0x3b0] sm:$0xff]  ;;  %v186_v12 = vld [vmem:[#allocation4 + $0x388] sm:$0xff] }
  0x4d   :  { %248 = vmatpush1.msra.mxu0 %v85_v50  ;;  %319 = vmatpush1.msra.mxu1 %v87_v51  ;;  %v188_v13 = vld [vmem:[#allocation4 + $0x398] sm:$0xff]  ;;  %v185_v14 = vld [vmem:[#allocation4 + $0x380] sm:$0xff]  ;;  %v187_v15 = vld [vmem:[#allocation4 + $0x390] sm:$0xff] }
  0x4e   :  { %249 = vmatprep.subr.mxu0 %v82_v52  ;;  %320 = vmatprep.subr.mxu1 %v84_v53  ;;  %v182_v16 = vld [vmem:[#allocation4 + $0x368] sm:$0xff]  ;;  %v184_v17 = vld [vmem:[#allocation4 + $0x378] sm:$0xff]  ;;  %v181_v18 = vld [vmem:[#allocation4 + $0x360] sm:$0xff] }
  0x4f   :  { %250 = vmatpush1.msra.mxu0 %v81_v54  ;;  %321 = vmatpush1.msra.mxu1 %v83_v55  ;;  %v183_v19 = vld [vmem:[#allocation4 + $0x370] sm:$0xff]  ;;  %v178_v20 = vld [vmem:[#allocation4 + $0x348] sm:$0xff]  ;;  %v180_v21 = vld [vmem:[#allocation4 + $0x358] sm:$0xff] }
  0x50   :  { %251 = vmatprep.subr.mxu0 %v78_v56  ;;  %322 = vmatprep.subr.mxu1 %v80_v57  ;;  %v177_v22 = vld [vmem:[#allocation4 + $0x340] sm:$0xff]  ;;  %v179_v23 = vld [vmem:[#allocation4 + $0x350] sm:$0xff]  ;;  %v174_v24 = vld [vmem:[#allocation4 + $0x328] sm:$0xff] }
  0x51   :  { %252 = vmatpush1.msra.mxu0 %v77_v58  ;;  %323 = vmatpush1.msra.mxu1 %v79_v59  ;;  %v176_v25 = vld [vmem:[#allocation4 + $0x338] sm:$0xff]  ;;  %v173_v26 = vld [vmem:[#allocation4 + $0x320] sm:$0xff]  ;;  %v175_v27 = vld [vmem:[#allocation4 + $0x330] sm:$0xff] }
  0x52   :  { %253 = vmatprep.subr.mxu0 %v74_v60  ;;  %324 = vmatprep.subr.mxu1 %v76_v61  ;;  %v170_v28 = vld [vmem:[#allocation4 + $0x308] sm:$0xff]  ;;  %v172_v29 = vld [vmem:[#allocation4 + $0x318] sm:$0xff]  ;;  %v169_v30 = vld [vmem:[#allocation4 + $0x300] sm:$0xff] }
  0x53   :  { %254 = vmatpush1.msra.mxu0 %v73_v62  ;;  %325 = vmatpush1.msra.mxu1 %v75_v63  ;;  %v171_v31 = vld [vmem:[#allocation4 + $0x310] sm:$0xff]  ;;  %v166_v32 = vld [vmem:[#allocation4 + $0x2e8] sm:$0xff]  ;;  %v168_v33 = vld [vmem:[#allocation4 + $0x2f8] sm:$0xff] }
  0x54   :  { %255 = vmatprep.subr.mxu0 %v198_v0  ;;  %326 = vmatprep.subr.mxu1 %v200_v1  ;;  %v165_v34 = vld [vmem:[#allocation4 + $0x2e0] sm:$0xff]  ;;  %v167_v35 = vld [vmem:[#allocation4 + $0x2f0] sm:$0xff]  ;;  %v162_v36 = vld [vmem:[#allocation4 + $0x2c8] sm:$0xff] }
  0x55   :  { %256 = vmatpush2.msra.mxu0 %v197_v2  ;;  %327 = vmatpush2.msra.mxu1 %v199_v3  ;;  %v164_v37 = vld [vmem:[#allocation4 + $0x2d8] sm:$0xff]  ;;  %v161_v38 = vld [vmem:[#allocation4 + $0x2c0] sm:$0xff]  ;;  %v163_v39 = vld [vmem:[#allocation4 + $0x2d0] sm:$0xff] }
  0x56   :  { %257 = vmatprep.subr.mxu0 %v194_v4  ;;  %328 = vmatprep.subr.mxu1 %v196_v5  ;;  %v158_v40 = vld [vmem:[#allocation4 + $0x2a8] sm:$0xff]  ;;  %v160_v41 = vld [vmem:[#allocation4 + $0x2b8] sm:$0xff]  ;;  %v157_v42 = vld [vmem:[#allocation4 + $0x2a0] sm:$0xff] }
  0x57   :  { %258 = vmatpush2.msra.mxu0 %v193_v6  ;;  %329 = vmatpush2.msra.mxu1 %v195_v7  ;;  %v159_v43 = vld [vmem:[#allocation4 + $0x2b0] sm:$0xff]  ;;  %v154_v44 = vld [vmem:[#allocation4 + $0x288] sm:$0xff]  ;;  %v156_v45 = vld [vmem:[#allocation4 + $0x298] sm:$0xff] }
  0x58   :  { %259 = vmatprep.subr.mxu0 %v190_v8  ;;  %330 = vmatprep.subr.mxu1 %v192_v9  ;;  %v153_v46 = vld [vmem:[#allocation4 + $0x280] sm:$0xff]  ;;  %v155_v47 = vld [vmem:[#allocation4 + $0x290] sm:$0xff]  ;;  %v150_v48 = vld [vmem:[#allocation4 + $0x268] sm:$0xff] }
  0x59   :  { %260 = vmatpush2.msra.mxu0 %v189_v10  ;;  %331 = vmatpush2.msra.mxu1 %v191_v11  ;;  %v152_v49 = vld [vmem:[#allocation4 + $0x278] sm:$0xff]  ;;  %v149_v50 = vld [vmem:[#allocation4 + $0x260] sm:$0xff]  ;;  %v151_v51 = vld [vmem:[#allocation4 + $0x270] sm:$0xff] }
  0x5a   :  { %261 = vmatprep.subr.mxu0 %v186_v12  ;;  %332 = vmatprep.subr.mxu1 %v188_v13  ;;  %v146_v52 = vld [vmem:[#allocation4 + $0x248] sm:$0xff]  ;;  %v148_v53 = vld [vmem:[#allocation4 + $0x258] sm:$0xff]  ;;  %v145_v54 = vld [vmem:[#allocation4 + $0x240] sm:$0xff] }
  0x5b   :  { %262 = vmatpush2.msra.mxu0 %v185_v14  ;;  %333 = vmatpush2.msra.mxu1 %v187_v15  ;;  %v147_v55 = vld [vmem:[#allocation4 + $0x250] sm:$0xff]  ;;  %v142_v56 = vld [vmem:[#allocation4 + $0x228] sm:$0xff]  ;;  %v144_v57 = vld [vmem:[#allocation4 + $0x238] sm:$0xff] }
  0x5c   :  { %263 = vmatprep.subr.mxu0 %v182_v16  ;;  %334 = vmatprep.subr.mxu1 %v184_v17  ;;  %v141_v58 = vld [vmem:[#allocation4 + $0x220] sm:$0xff]  ;;  %v143_v59 = vld [vmem:[#allocation4 + $0x230] sm:$0xff]  ;;  %v138_v60 = vld [vmem:[#allocation4 + $0x208] sm:$0xff] }
  0x5d   :  { %264 = vmatpush2.msra.mxu0 %v181_v18  ;;  %335 = vmatpush2.msra.mxu1 %v183_v19  ;;  %v140_v61 = vld [vmem:[#allocation4 + $0x218] sm:$0xff]  ;;  %v137_v62 = vld [vmem:[#allocation4 + $0x200] sm:$0xff]  ;;  %v139_v0 = vld [vmem:[#allocation4 + $0x210] sm:$0xff] }
  0x5e   :  { %265 = vmatprep.subr.mxu0 %v178_v20  ;;  %336 = vmatprep.subr.mxu1 %v180_v21  ;;  %v72_v63 = vld [vmem:[#allocation2 + $0x8] sm:$0xff]  ;;  %v71_v1 = vld [vmem:[#allocation2] sm:$0xff]  ;;  %v408_v10 = vld [vmem:[#allocation7 + $0x140] sm:$0xff] }
  0x5f   :  { %266 = vmatpush2.msra.mxu0 %v177_v22  ;;  %337 = vmatpush2.msra.mxu1 %v179_v23  ;;  %v414_v2 = vld [vmem:[#allocation7 + $0x170] sm:$0xff]  ;;  %v413_v4 = vld [vmem:[#allocation7 + $0x168] sm:$0xff]  ;;  %v411_v6 = vld [vmem:[#allocation7 + $0x158] sm:$0xff] }
  0x60   :  { %267 = vmatprep.subr.mxu0 %v174_v24  ;;  %338 = vmatprep.subr.mxu1 %v176_v25  ;;  %v510_v3 = vld [vmem:[#allocation7 + $0x470] sm:$0xff]  ;;  %v509_v5 = vld [vmem:[#allocation7 + $0x468] sm:$0xff]  ;;  %v507_v7 = vld [vmem:[#allocation7 + $0x458] sm:$0xff] }
  0x61   :  { %268 = vmatpush2.msra.mxu0 %v173_v26  ;;  %339 = vmatpush2.msra.mxu1 %v175_v27  ;;  %v410_v8 = vld [vmem:[#allocation7 + $0x150] sm:$0xff]  ;;  %v504_v11 = vld [vmem:[#allocation7 + $0x440] sm:$0xff]  ;;  %v407_v12 = vld [vmem:[#allocation7 + $0x138] sm:$0xff] }
  0x62   :  { %269 = vmatprep.subr.mxu0 %v170_v28  ;;  %340 = vmatprep.subr.mxu1 %v172_v29  ;;  %v506_v9 = vld [vmem:[#allocation7 + $0x450] sm:$0xff]  ;;  %v503_v13 = vld [vmem:[#allocation7 + $0x438] sm:$0xff]  ;;  %v405_v14 = vld [vmem:[#allocation7 + $0x128] sm:$0xff] }
  0x63   :  { %270 = vmatpush2.msra.mxu0 %v169_v30  ;;  %341 = vmatpush2.msra.mxu1 %v171_v31  ;;  %v501_v15 = vld [vmem:[#allocation7 + $0x428] sm:$0xff]  ;;  %v404_v16 = vld [vmem:[#allocation7 + $0x120] sm:$0xff]  ;;  %v402_v18 = vld [vmem:[#allocation7 + $0x110] sm:$0xff] }
  0x64   :  { %271 = vmatprep.subr.mxu0 %v166_v32  ;;  %342 = vmatprep.subr.mxu1 %v168_v33  ;;  %v500_v17 = vld [vmem:[#allocation7 + $0x420] sm:$0xff]  ;;  %v498_v19 = vld [vmem:[#allocation7 + $0x410] sm:$0xff]  ;;  %v401_v20 = vld [vmem:[#allocation7 + $0x108] sm:$0xff] }
  0x65   :  { %272 = vmatpush2.msra.mxu0 %v165_v34  ;;  %343 = vmatpush2.msra.mxu1 %v167_v35  ;;  %v497_v21 = vld [vmem:[#allocation7 + $0x408] sm:$0xff]  ;;  %v399_v22 = vld [vmem:[#allocation7 + $0xf8] sm:$0xff]  ;;  %v398_v24 = vld [vmem:[#allocation7 + $0xf0] sm:$0xff] }
  0x66   :  { %273 = vmatprep.subr.mxu0 %v162_v36  ;;  %344 = vmatprep.subr.mxu1 %v164_v37  ;;  %v495_v23 = vld [vmem:[#allocation7 + $0x3f8] sm:$0xff]  ;;  %v494_v25 = vld [vmem:[#allocation7 + $0x3f0] sm:$0xff]  ;;  %v396_v26 = vld [vmem:[#allocation7 + $0xe0] sm:$0xff] }
  0x67   :  { %274 = vmatpush2.msra.mxu0 %v161_v38  ;;  %345 = vmatpush2.msra.mxu1 %v163_v39  ;;  %v492_v27 = vld [vmem:[#allocation7 + $0x3e0] sm:$0xff]  ;;  %v395_v28 = vld [vmem:[#allocation7 + $0xd8] sm:$0xff]  ;;  %v393_v30 = vld [vmem:[#allocation7 + $0xc8] sm:$0xff] }
  0x68   :  { %275 = vmatprep.subr.mxu0 %v158_v40  ;;  %346 = vmatprep.subr.mxu1 %v160_v41  ;;  %v491_v29 = vld [vmem:[#allocation7 + $0x3d8] sm:$0xff]  ;;  %v489_v31 = vld [vmem:[#allocation7 + $0x3c8] sm:$0xff]  ;;  %v392_v32 = vld [vmem:[#allocation7 + $0xc0] sm:$0xff] }
  0x69   :  { %276 = vmatpush2.msra.mxu0 %v157_v42  ;;  %347 = vmatpush2.msra.mxu1 %v159_v43  ;;  %v488_v33 = vld [vmem:[#allocation7 + $0x3c0] sm:$0xff]  ;;  %v390_v34 = vld [vmem:[#allocation7 + $0xb0] sm:$0xff]  ;;  %v389_v36 = vld [vmem:[#allocation7 + $0xa8] sm:$0xff] }
  0x6a   :  { %277 = vmatprep.subr.mxu0 %v154_v44  ;;  %348 = vmatprep.subr.mxu1 %v156_v45  ;;  %v486_v35 = vld [vmem:[#allocation7 + $0x3b0] sm:$0xff]  ;;  %v485_v37 = vld [vmem:[#allocation7 + $0x3a8] sm:$0xff]  ;;  %v387_v38 = vld [vmem:[#allocation7 + $0x98] sm:$0xff] }
  0x6b   :  { %278 = vmatpush2.msra.mxu0 %v153_v46  ;;  %349 = vmatpush2.msra.mxu1 %v155_v47  ;;  %v483_v39 = vld [vmem:[#allocation7 + $0x398] sm:$0xff]  ;;  %v386_v40 = vld [vmem:[#allocation7 + $0x90] sm:$0xff]  ;;  %v384_v42 = vld [vmem:[#allocation7 + $0x80] sm:$0xff] }
  0x6c   :  { %279 = vmatprep.subr.mxu0 %v150_v48  ;;  %350 = vmatprep.subr.mxu1 %v152_v49  ;;  %v482_v41 = vld [vmem:[#allocation7 + $0x390] sm:$0xff]  ;;  %v480_v43 = vld [vmem:[#allocation7 + $0x380] sm:$0xff]  ;;  %v383_v44 = vld [vmem:[#allocation7 + $0x78] sm:$0xff] }
  0x6d   :  { %280 = vmatpush2.msra.mxu0 %v149_v50  ;;  %351 = vmatpush2.msra.mxu1 %v151_v51  ;;  %v479_v45 = vld [vmem:[#allocation7 + $0x378] sm:$0xff]  ;;  %v381_v46 = vld [vmem:[#allocation7 + $0x68] sm:$0xff]  ;;  %v380_v48 = vld [vmem:[#allocation7 + $0x60] sm:$0xff] }
  0x6e   :  { %281 = vmatprep.subr.mxu0 %v146_v52  ;;  %352 = vmatprep.subr.mxu1 %v148_v53  ;;  %v477_v47 = vld [vmem:[#allocation7 + $0x368] sm:$0xff]  ;;  %v476_v49 = vld [vmem:[#allocation7 + $0x360] sm:$0xff]  ;;  %v378_v50 = vld [vmem:[#allocation7 + $0x50] sm:$0xff] }
  0x6f   :  { %282 = vmatpush2.msra.mxu0 %v145_v54  ;;  %353 = vmatpush2.msra.mxu1 %v147_v55  ;;  %v474_v51 = vld [vmem:[#allocation7 + $0x350] sm:$0xff]  ;;  %v377_v52 = vld [vmem:[#allocation7 + $0x48] sm:$0xff]  ;;  %v375_v54 = vld [vmem:[#allocation7 + $0x38] sm:$0xff] }
  0x70   :  { %283 = vmatprep.subr.mxu0 %v142_v56  ;;  %354 = vmatprep.subr.mxu1 %v144_v57  ;;  %v473_v53 = vld [vmem:[#allocation7 + $0x348] sm:$0xff]  ;;  %v374_v55 = vld [vmem:[#allocation7 + $0x30] sm:$0xff]  ;;  %v372_v56 = vld [vmem:[#allocation7 + $0x20] sm:$0xff] }
  0x71   :  { %284 = vmatpush2.msra.mxu0 %v141_v58  ;;  %355 = vmatpush2.msra.mxu1 %v143_v59  ;;  %v371_v57 = vld [vmem:[#allocation7 + $0x18] sm:$0xff]  ;;  %v369_v58 = vld [vmem:[#allocation7 + $0x8] sm:$0xff]  ;;  %v368_v59 = vld [vmem:[#allocation7] sm:$0xff] }
  0x72   :  { %285 = vmatprep.subr.mxu0 %v138_v60  ;;  %356 = vmatprep.subr.mxu1 %v140_v61  ;;  %v462_v60 = vld [vmem:[#allocation7 + $0x2f0] sm:$0xff]  ;;  %v461_v61 = vld [vmem:[#allocation7 + $0x2e8] sm:$0xff] }
  0x73   :  { %286 = vmatpush2.msra.mxu0 %v137_v62  ;;  %287 = vmatprep.mubr.f32.mxu0 %v72_v63  ;;  %v459_v62 = vld [vmem:[#allocation7 + $0x2d8] sm:$0xff] }
  0x74   :  { %357 = vmatpush2.msra.mxu1 %v139_v0  ;;  %358 = vmatprep.mubr.f32.mxu1 %v72_v63  ;;  %v458_v63 = vld [vmem:[#allocation7 + $0x2d0] sm:$0xff]  ;;  %v456_v0 = vld [vmem:[#allocation7 + $0x2c0] sm:$0xff] }
  0x75   :  { %288 = vmatmul.mubr.f32.vlgmr.msra.gmra.mxu0 %v71_v1  ;;  %359 = vmatmul.mubr.f32.vlgmr.msra.gmra.mxu1 %v71_v1  ;;  %v455_v1 = vld [vmem:[#allocation7 + $0x2b8] sm:$0xff] }
  0x76   :  { %529 = vmatprep.subr.mxu0 %v414_v2  ;;  %600 = vmatprep.subr.mxu1 %v510_v3  ;;  %v453_v2 = vld [vmem:[#allocation7 + $0x2a8] sm:$0xff]  ;;  %v452_v3 = vld [vmem:[#allocation7 + $0x2a0] sm:$0xff] }
  0x77   :  { %530 = vmatpush1.msra.mxu0 %v413_v4  ;;  %601 = vmatpush1.msra.mxu1 %v509_v5  ;;  %v450_v4 = vld [vmem:[#allocation7 + $0x290] sm:$0xff]  ;;  %v449_v5 = vld [vmem:[#allocation7 + $0x288] sm:$0xff] }
  0x78   :  { %531 = vmatprep.subr.mxu0 %v411_v6  ;;  %602 = vmatprep.subr.mxu1 %v507_v7  ;;  %v447_v6 = vld [vmem:[#allocation7 + $0x278] sm:$0xff]  ;;  %v446_v7 = vld [vmem:[#allocation7 + $0x270] sm:$0xff] }
  0x79   :  { %532 = vmatpush1.msra.mxu0 %v410_v8  ;;  %603 = vmatpush1.msra.mxu1 %v506_v9  ;;  %v444_v8 = vld [vmem:[#allocation7 + $0x260] sm:$0xff]  ;;  %v443_v9 = vld [vmem:[#allocation7 + $0x258] sm:$0xff] }
  0x7a   :  { %533 = vmatprep.subr.mxu0 %v408_v10  ;;  %604 = vmatprep.subr.mxu1 %v504_v11  ;;  %v441_v10 = vld [vmem:[#allocation7 + $0x248] sm:$0xff]  ;;  %v440_v11 = vld [vmem:[#allocation7 + $0x240] sm:$0xff] }
  0x7b   :  { %534 = vmatpush1.msra.mxu0 %v407_v12  ;;  %605 = vmatpush1.msra.mxu1 %v503_v13  ;;  %v438_v12 = vld [vmem:[#allocation7 + $0x230] sm:$0xff]  ;;  %v437_v13 = vld [vmem:[#allocation7 + $0x228] sm:$0xff] }
  0x7c   :  { %535 = vmatprep.subr.mxu0 %v405_v14  ;;  %606 = vmatprep.subr.mxu1 %v501_v15  ;;  %v435_v14 = vld [vmem:[#allocation7 + $0x218] sm:$0xff]  ;;  %v434_v15 = vld [vmem:[#allocation7 + $0x210] sm:$0xff] }
  0x7d   :  { %536 = vmatpush1.msra.mxu0 %v404_v16  ;;  %607 = vmatpush1.msra.mxu1 %v500_v17  ;;  %v432_v16 = vld [vmem:[#allocation7 + $0x200] sm:$0xff]  ;;  %v431_v17 = vld [vmem:[#allocation7 + $0x1f8] sm:$0xff] }
  0x7e   :  { %537 = vmatprep.subr.mxu0 %v402_v18  ;;  %608 = vmatprep.subr.mxu1 %v498_v19  ;;  %v429_v18 = vld [vmem:[#allocation7 + $0x1e8] sm:$0xff]  ;;  %v428_v19 = vld [vmem:[#allocation7 + $0x1e0] sm:$0xff] }
  0x7f   :  { %538 = vmatpush1.msra.mxu0 %v401_v20  ;;  %609 = vmatpush1.msra.mxu1 %v497_v21  ;;  %v426_v20 = vld [vmem:[#allocation7 + $0x1d0] sm:$0xff]  ;;  %v425_v21 = vld [vmem:[#allocation7 + $0x1c8] sm:$0xff] }
  0x80   :  { %539 = vmatprep.subr.mxu0 %v399_v22  ;;  %610 = vmatprep.subr.mxu1 %v495_v23  ;;  %v423_v22 = vld [vmem:[#allocation7 + $0x1b8] sm:$0xff] }
  0x81   :  { %540 = vmatpush1.msra.mxu0 %v398_v24  ;;  %611 = vmatpush1.msra.mxu1 %v494_v25  ;;  %v471_v23 = vld [vmem:[#allocation7 + $0x338] sm:$0xff]  ;;  %v422_v24 = vld [vmem:[#allocation7 + $0x1b0] sm:$0xff] }
  0x82   :  { %541 = vmatprep.subr.mxu0 %v396_v26  ;;  %612 = vmatprep.subr.mxu1 %v492_v27  ;;  %v470_v25 = vld [vmem:[#allocation7 + $0x330] sm:$0xff]  ;;  %v420_v26 = vld [vmem:[#allocation7 + $0x1a0] sm:$0xff] }
  0x83   :  { %542 = vmatpush1.msra.mxu0 %v395_v28  ;;  %613 = vmatpush1.msra.mxu1 %v491_v29  ;;  %v468_v27 = vld [vmem:[#allocation7 + $0x320] sm:$0xff]  ;;  %v419_v28 = vld [vmem:[#allocation7 + $0x198] sm:$0xff] }
  0x84   :  { %543 = vmatprep.subr.mxu0 %v393_v30  ;;  %614 = vmatprep.subr.mxu1 %v489_v31  ;;  %v467_v29 = vld [vmem:[#allocation7 + $0x318] sm:$0xff]  ;;  %v417_v30 = vld [vmem:[#allocation7 + $0x188] sm:$0xff] }
  0x85   :  { %544 = vmatpush1.msra.mxu0 %v392_v32  ;;  %615 = vmatpush1.msra.mxu1 %v488_v33  ;;  %v465_v31 = vld [vmem:[#allocation7 + $0x308] sm:$0xff]  ;;  %v416_v32 = vld [vmem:[#allocation7 + $0x180] sm:$0xff] }
  0x86   :  { %545 = vmatprep.subr.mxu0 %v390_v34  ;;  %616 = vmatprep.subr.mxu1 %v486_v35  ;;  %v464_v33 = vld [vmem:[#allocation7 + $0x300] sm:$0xff]  ;;  %v463_v34 = vld [vmem:[#allocation7 + $0x2f8] sm:$0xff]  ;;  %v1107_v35 = vmov 0.0  }
  0x87   :  { %546 = vmatpush1.msra.mxu0 %v389_v36  ;;  %617 = vmatpush1.msra.mxu1 %v485_v37  ;;  %v203_v36 = vlaneseq }
  0x88   :  { %547 = vmatprep.subr.mxu0 %v387_v38  ;;  %618 = vmatprep.subr.mxu1 %v483_v39 }
  0x89   :  { %548 = vmatpush1.msra.mxu0 %v386_v40  ;;  %619 = vmatpush1.msra.mxu1 %v482_v41  ;;  %v1158_v37 = vshrl.u32 %v203_v36, 7  ;;  %v201_v40 = vld [vmem:[#allocation6] sm:$0xf] }
  0x8a   :  { %549 = vmatprep.subr.mxu0 %v384_v42  ;;  %620 = vmatprep.subr.mxu1 %v480_v43 }
  0x8b   :  { %550 = vmatpush1.msra.mxu0 %v383_v44  ;;  %621 = vmatpush1.msra.mxu1 %v479_v45  ;;  %v205_v38 = vsub.s32 0, %v1158_v37  ;;  %v213_v39 = vsub.s32 2, %v1158_v37  ;;  %v209_v41 = vsub.s32 1, %v1158_v37  ;;  %v217_v42 = vsub.s32 3, %v1158_v37 }
  0x8c   :  { %551 = vmatprep.subr.mxu0 %v381_v46  ;;  %622 = vmatprep.subr.mxu1 %v477_v47 }
  0x8d   :  { %552 = vmatpush1.msra.mxu0 %v380_v48  ;;  %623 = vmatpush1.msra.mxu1 %v476_v49  ;;  %v206_v43 = vrot.slane %v201_v40, %v205_v38  ;;  %v214_v44 = vrot.slane %v201_v40, %v213_v39  ;;  %v210_v45 = vrot.slane %v201_v40, %v209_v41 }
  0x8e   :  { %553 = vmatprep.subr.mxu0 %v378_v50  ;;  %624 = vmatprep.subr.mxu1 %v474_v51  ;;  %v218_v46 = vrot.slane %v201_v40, %v217_v42  ;;  %v472_v40 = vld [vmem:[#allocation7 + $0x340] sm:$0xff]  ;;  %v421_v42 = vld [vmem:[#allocation7 + $0x1a8] sm:$0xff] }
  0x8f   :  { %554 = vmatpush1.msra.mxu0 %v377_v52  ;;  %625 = vmatpush1.msra.mxu1 %v473_v53 }
  0x90   :  { %555 = vmatprep.subr.mxu0 %v375_v54  ;;  %626 = vmatprep.subr.mxu1 %v471_v23  ;;  %v484_v23 = vld [vmem:[#allocation7 + $0x3a0] sm:$0xff] }
  0x91   :  { %556 = vmatpush1.msra.mxu0 %v374_v55  ;;  %627 = vmatpush1.msra.mxu1 %v470_v25  ;;  %v385_v25 = vld [vmem:[#allocation7 + $0x88] sm:$0xff] }
  0x92   :  { %557 = vmatprep.subr.mxu0 %v372_v56  ;;  %628 = vmatprep.subr.mxu1 %v468_v27  ;;  %v430_v27 = vld [vmem:[#allocation7 + $0x1f0] sm:$0xff] }
  0x93   :  { %558 = vmatpush1.msra.mxu0 %v371_v57  ;;  %629 = vmatpush1.msra.mxu1 %v467_v29  ;;  %v478_v29 = vld [vmem:[#allocation7 + $0x370] sm:$0xff] }
  0x94   :  { %559 = vmatprep.subr.mxu0 %v369_v58  ;;  %630 = vmatprep.subr.mxu1 %v465_v31  ;;  %v379_v31 = vld [vmem:[#allocation7 + $0x58] sm:$0xff] }
  0x95   :  { %560 = vmatpush1.msra.mxu0 %v368_v59  ;;  %631 = vmatpush1.msra.mxu1 %v464_v33  ;;  %v415_v59 = vld [vmem:[#allocation7 + $0x178] sm:$0xff]  ;;  %v424_v33 = vld [vmem:[#allocation7 + $0x1c0] sm:$0xff] }
  0x96   :  { %561 = vmatprep.subr.mxu0 %v462_v60  ;;  %664 = vmatprep.mubr.f32.mxu1 %v1107_v35  ;;  %v511_v60 = vld [vmem:[#allocation7 + $0x478] sm:$0xff] }
  0x97   :  { %562 = vmatpush2.msra.mxu0 %v461_v61  ;;  %892 = vmatprep.subr.mxu1 %v463_v34  ;;  %v460_v61 = vld [vmem:[#allocation7 + $0x2e0] sm:$0xff] }
  0x98   :  { %563 = vmatprep.subr.mxu0 %v459_v62  ;;  %v412_v62 = vld [vmem:[#allocation7 + $0x160] sm:$0xff] }
  0x99   :  { %564 = vmatpush2.msra.mxu0 %v458_v63  ;;  %v508_v63 = vld [vmem:[#allocation7 + $0x460] sm:$0xff] }
  0x9a   :  { %565 = vmatprep.subr.mxu0 %v456_v0  ;;  %v457_v0 = vld [vmem:[#allocation7 + $0x2c8] sm:$0xff]  ;;  %v376_v34 = vld [vmem:[#allocation7 + $0x40] sm:$0xff] }
  0x9b   :  { %566 = vmatpush2.msra.mxu0 %v455_v1  ;;  %v409_v1 = vld [vmem:[#allocation7 + $0x148] sm:$0xff] }
  0x9c   :  { %567 = vmatprep.subr.mxu0 %v453_v2  ;;  %v505_v2 = vld [vmem:[#allocation7 + $0x448] sm:$0xff] }
  0x9d   :  { %568 = vmatpush2.msra.mxu0 %v452_v3  ;;  %v454_v3 = vld [vmem:[#allocation7 + $0x2b0] sm:$0xff] }
  0x9e   :  { %569 = vmatprep.subr.mxu0 %v450_v4  ;;  %v406_v4 = vld [vmem:[#allocation7 + $0x130] sm:$0xff] }
  0x9f   :  { %570 = vmatpush2.msra.mxu0 %v449_v5  ;;  %v502_v5 = vld [vmem:[#allocation7 + $0x430] sm:$0xff] }
  0xa0   :  { %571 = vmatprep.subr.mxu0 %v447_v6  ;;  %v451_v6 = vld [vmem:[#allocation7 + $0x298] sm:$0xff] }
  0xa1   :  { %572 = vmatpush2.msra.mxu0 %v446_v7  ;;  %v403_v7 = vld [vmem:[#allocation7 + $0x118] sm:$0xff] }
  0xa2   :  { %573 = vmatprep.subr.mxu0 %v444_v8  ;;  %v499_v8 = vld [vmem:[#allocation7 + $0x418] sm:$0xff] }
  0xa3   :  { %574 = vmatpush2.msra.mxu0 %v443_v9  ;;  %v448_v9 = vld [vmem:[#allocation7 + $0x280] sm:$0xff] }
  0xa4   :  { %575 = vmatprep.subr.mxu0 %v441_v10  ;;  %v400_v10 = vld [vmem:[#allocation7 + $0x100] sm:$0xff] }
  0xa5   :  { %576 = vmatpush2.msra.mxu0 %v440_v11  ;;  %v496_v11 = vld [vmem:[#allocation7 + $0x400] sm:$0xff] }
  0xa6   :  { %577 = vmatprep.subr.mxu0 %v438_v12  ;;  %v445_v12 = vld [vmem:[#allocation7 + $0x268] sm:$0xff] }
  0xa7   :  { %578 = vmatpush2.msra.mxu0 %v437_v13  ;;  %v397_v13 = vld [vmem:[#allocation7 + $0xe8] sm:$0xff] }
  0xa8   :  { %579 = vmatprep.subr.mxu0 %v435_v14  ;;  %v493_v14 = vld [vmem:[#allocation7 + $0x3e8] sm:$0xff] }
  0xa9   :  { %580 = vmatpush2.msra.mxu0 %v434_v15  ;;  %v442_v15 = vld [vmem:[#allocation7 + $0x250] sm:$0xff] }
  0xaa   :  { %581 = vmatprep.subr.mxu0 %v432_v16  ;;  %v394_v16 = vld [vmem:[#allocation7 + $0xd0] sm:$0xff] }
  0xab   :  { %582 = vmatpush2.msra.mxu0 %v431_v17  ;;  %v490_v17 = vld [vmem:[#allocation7 + $0x3d0] sm:$0xff] }
  0xac   :  { %583 = vmatprep.subr.mxu0 %v429_v18  ;;  %v439_v18 = vld [vmem:[#allocation7 + $0x238] sm:$0xff] }
  0xad   :  { %584 = vmatpush2.msra.mxu0 %v428_v19  ;;  %v391_v19 = vld [vmem:[#allocation7 + $0xb8] sm:$0xff] }
  0xae   :  { %585 = vmatprep.subr.mxu0 %v426_v20  ;;  %v487_v20 = vld [vmem:[#allocation7 + $0x3b8] sm:$0xff] }
  0xaf   :  { %586 = vmatpush2.msra.mxu0 %v425_v21  ;;  %v436_v21 = vld [vmem:[#allocation7 + $0x220] sm:$0xff] }
  0xb0   :  { %587 = vmatprep.subr.mxu0 %v423_v22  ;;  %v388_v22 = vld [vmem:[#allocation7 + $0xa0] sm:$0xff] }
  0xb1   :  { %588 = vmatpush2.msra.mxu0 %v422_v24  ;;  %v433_v24 = vld [vmem:[#allocation7 + $0x208] sm:$0xff] }
  0xb2   :  { %589 = vmatprep.subr.mxu0 %v420_v26  ;;  %v481_v26 = vld [vmem:[#allocation7 + $0x388] sm:$0xff] }
  0xb3   :  { %590 = vmatpush2.msra.mxu0 %v419_v28  ;;  %v382_v28 = vld [vmem:[#allocation7 + $0x70] sm:$0xff] }
  0xb4   :  { %591 = vmatprep.subr.mxu0 %v417_v30  ;;  %v427_v30 = vld [vmem:[#allocation7 + $0x1d8] sm:$0xff] }
  0xb5   :  { %592 = vmatpush2.msra.mxu0 %v416_v32  ;;  %v475_v32 = vld [vmem:[#allocation7 + $0x358] sm:$0xff] }
  0xb6   :  { %944 = vmatprep.subr.mxu0 %v1107_v35 }
 0x135   :  { %v289_v47 = vpop.f32.mrf.mxu0  ;;  %v360_v48 = vpop.f32.mrf.mxu1 }
 0x136   :  { %v1170_v49 = vadd.f32 %v289_v47, %v206_v43  ;;  %v361_v50 = vadd.f32 %v360_v48, %v214_v44  ;;  %v373_v43 = vld [vmem:[#allocation7 + $0x28] sm:$0xff]  ;;  %v466_v47 = vld [vmem:[#allocation7 + $0x310] sm:$0xff] }
 0x137   :  { %v291_v51 = vpop.f32.mrf.mxu0  ;;  %v362_v52 = vpop.f32.mrf.mxu1  ;;  %v469_v44 = vld [vmem:[#allocation7 + $0x328] sm:$0xff] }
 0x138   :  { %v366_v53 = vmax.f32 %v361_v50, 0.0  ;;  %v1172_v54 = vadd.f32 %v291_v51, %v210_v45  ;;  %v1174_v55 = vadd.f32 %v362_v52, %v218_v46  ;;  %v812_v56 = vsel %vm811_vm0, %v1170_v49, -inf  ;;  %v418_v45 = vld [vmem:[#allocation7 + $0x190] sm:$0xff] }
 0x139   :  { %813 = vmax.xlane.f32.xlu0 %v812_v56  ;;  %v370_v46 = vld [vmem:[#allocation7 + $0x10] sm:$0xff] }
 0x13a   :  { %v365_v57 = vmax.f32 %v1172_v54, 0.0  ;;  %v367_v58 = vmax.f32 %v1174_v55, 0.0  ;;  %593 = vmatprep.mubr.f32.mxu0 %v366_v53  ;;  %v829_v54 = vand.u32 127, %v203_v36 }
 0x13c   :  { %594 = vmatmul.mubr.f32.vlgmr.msra.gmra.mxu0 %v365_v57  ;;  %665 = vmatmul.mubr.f32.vlgmr.msra.gmra.mxu1 %v367_v58  ;;  %vm830_vm2 = vcmp.lt.s32.totalorder %v829_v54, 31 }
 0x13d   :  { %893 = vmatpush3.msra.mxu1 %v415_v59  ;;  %945 = vmatpush3.msra.mxu0 %v511_v60 }
 0x13e   :  { %894 = vmatprep.subr.mxu1 %v460_v61  ;;  %946 = vmatprep.subr.mxu0 %v1107_v35 }
 0x13f   :  { %895 = vmatpush3.msra.mxu1 %v412_v62  ;;  %947 = vmatpush3.msra.mxu0 %v508_v63 }
 0x140   :  { %896 = vmatprep.subr.mxu1 %v457_v0  ;;  %948 = vmatprep.subr.mxu0 %v1107_v35 }
 0x141   :  { %897 = vmatpush3.msra.mxu1 %v409_v1  ;;  %949 = vmatpush3.msra.mxu0 %v505_v2 }
 0x142   :  { %898 = vmatprep.subr.mxu1 %v454_v3  ;;  %950 = vmatprep.subr.mxu0 %v1107_v35 }
 0x143   :  { %899 = vmatpush3.msra.mxu1 %v406_v4  ;;  %735 = vmatprep.mubr.f32.mxu1 %v366_v53  ;;  %v512_v53 = vld [vmem:[%s1228_s4] sm:$0x7] }
 0x144   :  { %951 = vmatpush3.msra.mxu0 %v502_v5  ;;  %900 = vmatprep.subr.mxu1 %v451_v6  ;;  %v521_v55 = vrot.slane %v512_v53, %v209_v41  ;;  %v525_v41 = vrot.slane %v512_v53, %v213_v39 }
 0x145   :  { %952 = vmatprep.subr.mxu0 %v1107_v35  ;;  %901 = vmatpush3.msra.mxu1 %v403_v7 }
 0x146   :  { %953 = vmatpush3.msra.mxu0 %v499_v8  ;;  %902 = vmatprep.subr.mxu1 %v448_v9 }
 0x147   :  { %954 = vmatprep.subr.mxu0 %v1107_v35  ;;  %903 = vmatpush3.msra.mxu1 %v400_v10  ;;  %v1110_v10 = vmov 73  }
 0x148   :  { %955 = vmatpush3.msra.mxu0 %v496_v11  ;;  %904 = vmatprep.subr.mxu1 %v445_v12  ;;  %v1111_v11 = vmov 72  }
 0x149   :  { %956 = vmatprep.subr.mxu0 %v1107_v35  ;;  %905 = vmatpush3.msra.mxu1 %v397_v13 }
 0x14a   :  { %957 = vmatpush3.msra.mxu0 %v493_v14  ;;  %906 = vmatprep.subr.mxu1 %v442_v15 }
 0x14b   :  { %958 = vmatprep.subr.mxu0 %v1107_v35  ;;  %907 = vmatpush3.msra.mxu1 %v394_v16 }
 0x14c   :  { %959 = vmatpush3.msra.mxu0 %v490_v17  ;;  %908 = vmatprep.subr.mxu1 %v439_v18 }
 0x14d   :  { %960 = vmatprep.subr.mxu0 %v1107_v35  ;;  %909 = vmatpush3.msra.mxu1 %v391_v19 }
 0x14e   :  { %961 = vmatpush3.msra.mxu0 %v487_v20  ;;  %910 = vmatprep.subr.mxu1 %v436_v21 }
 0x14f   :  { %962 = vmatprep.subr.mxu0 %v1107_v35  ;;  %911 = vmatpush3.msra.mxu1 %v388_v22 }
 0x150   :  { %963 = vmatpush3.msra.mxu0 %v484_v23  ;;  %912 = vmatprep.subr.mxu1 %v433_v24 }
 0x151   :  { %964 = vmatprep.subr.mxu0 %v1107_v35  ;;  %913 = vmatpush3.msra.mxu1 %v385_v25 }
 0x152   :  { %965 = vmatpush3.msra.mxu0 %v481_v26  ;;  %914 = vmatprep.subr.mxu1 %v430_v27 }
 0x153   :  { %966 = vmatprep.subr.mxu0 %v1107_v35  ;;  %915 = vmatpush3.msra.mxu1 %v382_v28  ;;  %v1112_v28 = vmov 74  }
 0x154   :  { %967 = vmatpush3.msra.mxu0 %v478_v29  ;;  %916 = vmatprep.subr.mxu1 %v427_v30 }
 0x155   :  { %968 = vmatprep.subr.mxu0 %v1107_v35  ;;  %917 = vmatpush3.msra.mxu1 %v379_v31 }
 0x156   :  { %969 = vmatpush3.msra.mxu0 %v475_v32  ;;  %918 = vmatprep.subr.mxu1 %v424_v33 }
 0x157   :  { %970 = vmatprep.subr.mxu0 %v1107_v35  ;;  %919 = vmatpush3.msra.mxu1 %v376_v34 }
 0x158   :  { %971 = vmatpush3.msra.mxu0 %v472_v40  ;;  %920 = vmatprep.subr.mxu1 %v421_v42 }
 0x159   :  { %972 = vmatprep.subr.mxu0 %v1107_v35  ;;  %921 = vmatpush3.msra.mxu1 %v373_v43 }
 0x15a   :  { %973 = vmatpush3.msra.mxu0 %v469_v44  ;;  %922 = vmatprep.subr.mxu1 %v418_v45 }
 0x15b   :  { %974 = vmatprep.subr.mxu0 %v1107_v35  ;;  %923 = vmatpush3.msra.mxu1 %v370_v46 }
 0x15c   :  { %975 = vmatpush3.msra.mxu0 %v466_v47  ;;  %976 = vmatprep.mubr.msk.f32.mxu0 %vm1108_vm1, %v1107_v35  ;;  %v517_v35 = vrot.slane %v512_v53, %v205_v38 }
 0x15d   :  { %736 = vmatmul.mubr.f32.vlgmr.msra.gmra.mxu1 %v365_v57  ;;  %977 = vmatmul.mubr.f32.vlgmr.msra.gmra.mxu0 %v367_v58 }
 0x15e   :  { %994 = vset.pattern.permute.xlu0 %v1110_v10  ;;  %993 = vset.pattern.permute.xlu1 %v1111_v11 }
 0x1c2   :  { %v814_v48 = vpop.xlane.xlu0 %813 }
 0x1c3   :  { %v815_v50 = vsub.f32 %v1170_v49, %v814_v48 }
 0x1c5   :  { %v816_v51 = vmul.f32 1.442695, %v815_v50 }
 0x1c7   :  { %997 = vpow2.f32 %v816_v51 }
 0x1d4   :  { %v998_v52 = vpop.eup %997 }
 0x1d5   :  { %819 = vrot.lane.b32.xlu0 %v998_v52, %s1109_s2 }
 0x1fc   :  { %v595_v56 = vpop.f32.mrf.mxu0  ;;  %v666_v57 = vpop.f32.mrf.mxu1 }
 0x1fd   :  { %v596_v58 = vadd.f32 %v595_v56, %v517_v35 }
 0x1fe   :  { %v597_v59 = vpop.f32.mrf.mxu0  ;;  %v668_v60 = vpop.f32.mrf.mxu1 }
 0x1ff   :  { %v598_v61 = vadd.f32 %v597_v59, %v521_v55  ;;  %v667_v62 = vadd.f32 %v666_v57, %v596_v58 }
 0x201   :  { %v669_v63 = vadd.f32 %v668_v60, %v598_v61  ;;  %v831_v0 = vsel %vm830_vm2, %v667_v62, -1e+30 }
 0x202   :  { %832 = vmax.xlane.f32.xlu1 %v831_v0 }
 0x203   :  { %v849_v1 = vsel %vm830_vm2, %v669_v63, -1e+30 }
 0x206   :  { %850 = vmax.xlane.f32.xlu1 %v849_v1 }
 0x21d   :  { %v924_v38 = vpop.f32.mrf.mxu1  ;;  %v807_v36 = vpop.f32.mrf.mxu0 }
 0x21f   :  { %v925_v2 = vpop.f32.mrf.mxu1  ;;  %v978_v3 = vpop.f32.mrf.mxu0 }
 0x220   :  { %v926_v4 = vadd.f32 %v925_v2, %v924_v38 }
 0x222   :  { %v738_v5 = vadd.f32 %v926_v4, %v525_v41 }
 0x224   :  { %v808_v6 = vadd.f32 %v807_v36, %v738_v5 }
 0x226   :  { %v866_v7 = vsel %vm830_vm2, %v808_v6, -1e+30 }
 0x227   :  { %867 = vmax.xlane.f32.xlu1 %v866_v7 }
 0x247   :  { %v820_v8 = vpop.permute.xlu0 %819 }
 0x248   :  { %v823_v9 = vsel %vm822_vm3, %v820_v8, 0.0 }
 0x249   :  { %824 = vadd.xlane.f32.xlu1 %v823_v9 }
 0x28b   :  { %v833_v12 = vpop.xlane.xlu1 %832 }
 0x28c   :  { %v834_v13 = vsub.f32 %v831_v0, %v833_v12 }
 0x28e   :  { %v835_v37 = vmul.f32 1.442695, %v834_v13 }
 0x28f   :  { %v851_v39 = vpop.xlane.xlu1 %850 }
 0x290   :  { %999 = vpow2.f32 %v835_v37  ;;  %v852_v14 = vsub.f32 %v849_v1, %v851_v39 }
 0x292   :  { %v853_v15 = vmul.f32 1.442695, %v852_v14 }
 0x294   :  { %1001 = vpow2.f32 %v853_v15 }
 0x29d   :  { %v1000_v16 = vpop.eup %999 }
 0x29e   :  { %v837_v17 = vsel %vm830_vm2, %v1000_v16, 0.0 }
 0x29f   :  { %838 = vadd.xlane.f32.xlu1 %v837_v17 }
 0x2a1   :  { %v1002_v18 = vpop.eup %1001 }
 0x2a2   :  { %v855_v19 = vsel %vm830_vm2, %v1002_v18, 0.0 }
 0x2a3   :  { %856 = vadd.xlane.f32.xlu0 %v855_v19 }
 0x2b0   :  { %v868_v20 = vpop.xlane.xlu1 %867 }
 0x2b1   :  { %v869_v21 = vsub.f32 %v866_v7, %v868_v20 }
 0x2b3   :  { %v870_v22 = vmul.f32 1.442695, %v869_v21 }
 0x2b5   :  { %1003 = vpow2.f32 %v870_v22 }
 0x2c2   :  { %v1004_v23 = vpop.eup %1003 }
 0x2c3   :  { %v872_v24 = vsel %vm830_vm2, %v1004_v23, 0.0 }
 0x2c4   :  { %873 = vadd.xlane.f32.xlu1 %v872_v24 }
 0x2d2   :  { %v825_v25 = vpop.xlane.xlu1 %824 }
 0x2d3   :  { %1005 = vrcp.f32 %v825_v25 }
 0x2e0   :  { %v1006_v26 = vpop.eup %1005 }
 0x2e1   :  { %v827_v27 = vmul.f32 %v1006_v26, %v998_v52 }
 0x2e3   :  { %861 = vperm.xlu0 %994, %v827_v27   ;;  %844 = vperm.xlu1 %993, %v827_v27  }
 0x2e7   :  { %995 = vset.pattern.permute.xlu1 %v1112_v28  ;;  %996 = vset.pattern.permute.xlu0 %v1112_v28 }
 0x2e8   :  { %878 = vperm.xlu1 %995, %v827_v27  }
 0x328   :  { %v839_v29 = vpop.xlane.xlu1 %838 }
 0x329   :  { %1007 = vrcp.f32 %v839_v29 }
 0x32c   :  { %v857_v30 = vpop.xlane.xlu0 %856 }
 0x32d   :  { %1009 = vrcp.f32 %v857_v30 }
 0x336   :  { %v1008_v32 = vpop.eup %1007 }
 0x337   :  { %v841_v34 = vmul.f32 %v1008_v32, %v837_v17 }
 0x33a   :  { %v1010_v33 = vpop.eup %1009 }
 0x33b   :  { %v859_v42 = vmul.f32 %v1010_v33, %v855_v19 }
 0x34d   :  { %v874_v31 = vpop.xlane.xlu1 %873 }
 0x34e   :  { %1011 = vrcp.f32 %v874_v31 }
 0x35b   :  { %v1012_v44 = vpop.eup %1011 }
 0x35c   :  { %v876_v47 = vmul.f32 %v1012_v44, %v872_v24 }
 0x35e   :  { %v845_v40 = vpop.permute.xlu1 %844  ;;  %v862_v43 = vpop.permute.xlu0 %861 }
 0x35f   :  { %v847_v45 = vmul.f32 %v845_v40, %v841_v34  ;;  %v864_v46 = vmul.f32 %v862_v43, %v859_v42 }
 0x361   :  { %v865_v50 = vadd.f32 %v864_v46, %v847_v45 }
 0x363   :  { %v879_v48 = vpop.permute.xlu1 %878 }
 0x364   :  { %v881_v51 = vmul.f32 %v879_v48, %v876_v47 }
 0x366   :  { %v882_v52 = vadd.f32 %v881_v51, %v865_v50 }
 0x368   :  { %v883_v53 = vadd.f32 %v882_v52, %v1170_v49 }
 0x36a   :  { %884 = vst [vmem:[%s1229_s5] sm:$0xff] %v883_v53 }
 0x36b   :  { %889 = vsyncpa [#allocation3], 1 }
 0x36c   :  { %890 = vsyncpa [#allocation5], 1 }
 0x36d   :  { %891 = vsyncpa [#allocation8], 1 }

</bundles_post_ra>
